<compile_context>
chip_gen: v7x
topology: tpu7x:2x2x1
jax: 0.10.0
libtpu: 0.0.40
codegen_flags: <defaults>
</compile_context>

<pallas_src>
import math
import functools

import jax
import jax.numpy as jnp
from jax.experimental import pallas as pl
from jax.experimental.pallas import tpu as pltpu


def _round_up(x, m):
    return (x + m - 1) // m * m


# ----------------------------- Pallas kernel --------------------------------
def _edge_mlp_kernel(edges_ref, xe_ref, pa_ref, pb_ref, w1e_ref, b1_ref,
                     w2_ref, b2_ref, o_ref):
    # edges_ref: (te, 2) int32 node indices (sender, receiver)
    # xe_ref:    (te, Fe) edge states
    # pa_ref/pb_ref: (N_pad, H_pad) node_state already projected through the
    #                node blocks of W1 (sender / receiver halves)
    # w1e_ref: (Fe, H_pad), b1_ref: (1, H_pad), w2_ref: (H_pad, Fe), b2: (1, Fe)
    idx = edges_ref[...]                                   # (te, 2) int32
    te = idx.shape[0]
    n_pad = pa_ref.shape[0]
    node_iota = jax.lax.broadcasted_iota(jnp.int32, (te, n_pad), 1)

    # One-hot selection of the precomputed node projections (fused gather).
    # The MXU has large slack in this memory-bound kernel, so these small
    # contractions (K = N_pad) are effectively free.
    oh_i = (idx[:, 0:1] == node_iota).astype(pa_ref.dtype)  # (te, N_pad)
    oh_j = (idx[:, 1:2] == node_iota).astype(pb_ref.dtype)  # (te, N_pad)

    h = (jnp.dot(oh_i, pa_ref[...], preferred_element_type=jnp.float32)
         + jnp.dot(oh_j, pb_ref[...], preferred_element_type=jnp.float32)
         + jnp.dot(xe_ref[...], w1e_ref[...], preferred_element_type=jnp.float32)
         + b1_ref[...])

    # Shifted softplus: log(1 + exp(h)) - log(2)  (numerically stable, f32)
    h = (jnp.maximum(h, 0.0) + jnp.log1p(jnp.exp(-jnp.abs(h)))
         - jnp.float32(math.log(2.0)))

    out = (jnp.dot(h.astype(w2_ref.dtype), w2_ref[...],
                   preferred_element_type=jnp.float32) + b2_ref[...])
    o_ref[...] = out.astype(o_ref.dtype)


# --------------------------- parameter preparation ---------------------------
def prepare_edge_update_params(params, node_size):
    """One-time (outside jit) split + lane padding of the MLP weights.

    w1 (2N+Fe, H) is split into the sender-node / receiver-node / edge blocks;
    the hidden dim H is zero-padded to a multiple of 128 (padded W2 rows are
    zero, so the padded hidden columns contribute exactly 0).
    """
    w1, b1, w2, b2 = params["w1"], params["b1"], params["w2"], params["b2"]
    din, H = w1.shape
    Fe = w2.shape[1]
    assert din == 2 * node_size + Fe

    H_pad = _round_up(H, 128)
    pad_h = lambda m: jnp.pad(m, ((0, 0), (0, H_pad - H)))
    return {
        "w1a": pad_h(w1[:node_size, :]),                   # (node_size, H_pad)
        "w1b": pad_h(w1[node_size:2 * node_size, :]),      # (node_size, H_pad)
        "w1e": pad_h(w1[2 * node_size:, :]),               # (Fe, H_pad)
        "b1": jnp.pad(b1, (0, H_pad - H)).reshape(1, H_pad),
        "w2": jnp.pad(w2, ((0, H_pad - H), (0, 0))),       # (H_pad, Fe)
        "b2": b2.reshape(1, Fe),
    }


# ------------------------------- forward --------------------------------------
def edge_update_forward(edge_state, edges, node_state, prep, *,
                        tile_edges=2048, io_dtype=jnp.float32):
    """
    edge_state: (num_edges, edge_size)
    edges:      (num_edges, 2) int node indices
    node_state: (num_nodes, node_size)
    prep:       output of prepare_edge_update_params
    Returns:    (num_edges, edge_size)
    """
    E, Fe = edge_state.shape
    N, node_size = node_state.shape
    H_pad = prep["w1a"].shape[1]
    assert prep["w1a"].shape[0] == node_size

    # Project node states through the node blocks of the first layer once
    # (tiny matmul, highest precision) -> the in-kernel gather becomes a
    # one-hot selection of these rows.
    pa = jnp.dot(node_state, prep["w1a"], precision=jax.lax.Precision.HIGHEST)
    pb = jnp.dot(node_state, prep["w1b"], precision=jax.lax.Precision.HIGHEST)
    N_pad = _round_up(N, 8)
    if N_pad != N:
        pa = jnp.pad(pa, ((0, N_pad - N), (0, 0)))
        pb = jnp.pad(pb, ((0, N_pad - N), (0, 0)))

    w1e, b1, w2, b2 = prep["w1e"], prep["b1"], prep["w2"], prep["b2"]
    xe = edge_state
    if jnp.dtype(io_dtype) != edge_state.dtype:
        # Optional bf16 I/O (v6e/v7x): halves HBM bytes of the E-sized tensors.
        xe, pa, pb, w1e, w2 = (a.astype(io_dtype) for a in (xe, pa, pb, w1e, w2))

    # Edge tiling: big tiles to amortize per-grid-step overhead, but at least
    # 2 grid steps so both v7x TensorCores get work.  te multiple of 16 keeps
    # the bf16 path's sublane packing happy as well.
    te_cap = _round_up((E + 1) // 2, 16)
    te = max(16, min(_round_up(tile_edges, 16), te_cap))
    E_pad = _round_up(E, te)

    edges_i32 = edges.astype(jnp.int32)
    if E_pad != E:
        # Padded rows use node index 0 (in bounds); their outputs are sliced off.
        edges_i32 = jnp.pad(edges_i32, ((0, E_pad - E), (0, 0)))
        xe = jnp.pad(xe, ((0, E_pad - E), (0, 0)))

    grid = (E_pad // te,)
    item = lambda a: a.size * a.dtype.itemsize
    cost = pl.CostEstimate(
        flops=2 * E_pad * (2 * N_pad * H_pad + Fe * H_pad + H_pad * Fe),
        transcendentals=2 * E_pad * H_pad,
        bytes_accessed=(item(edges_i32) + item(xe) + E_pad * Fe * 4
                        + 2 * item(pa) + item(w1e) + item(w2)
                        + item(b1) + item(b2)),
    )

    out = pl.pallas_call(
        _edge_mlp_kernel,
        out_shape=jax.ShapeDtypeStruct((E_pad, Fe), edge_state.dtype),
        grid_spec=pltpu.PrefetchScalarGridSpec(
            num_scalar_prefetch=0,
            grid=grid,
            in_specs=[
                pl.BlockSpec((te, 2), lambda i: (i, 0)),        # edge index pairs
                pl.BlockSpec((te, Fe), lambda i: (i, 0)),       # edge states
                pl.BlockSpec((N_pad, H_pad), lambda i: (0, 0)),  # node proj (sender)
                pl.BlockSpec((N_pad, H_pad), lambda i: (0, 0)),  # node proj (receiver)
                pl.BlockSpec((Fe, H_pad), lambda i: (0, 0)),     # W1 (edge block)
                pl.BlockSpec((1, H_pad), lambda i: (0, 0)),      # b1
                pl.BlockSpec((H_pad, Fe), lambda i: (0, 0)),     # W2
                pl.BlockSpec((1, Fe), lambda i: (0, 0)),         # b2
            ],
            out_specs=pl.BlockSpec((te, Fe), lambda i: (i, 0)),
        ),
        compiler_params=pltpu.CompilerParams(
            dimension_semantics=("parallel",),   # megacore / dual-TC sharding
        ),
        cost_estimate=cost,
    )(edges_i32, xe, pa, pb, w1e, b1, w2, b2)

    return out if E_pad == E else out[:E]


# ------------------------------- init -----------------------------------------
def init_edge_update_params(key, edge_size, node_size, dtype=jnp.float32):
    """Deterministic init matching nn.Linear default (U[-1/sqrt(fan_in), +])."""
    din = 2 * node_size + edge_size
    hidden = 2 * edge_size
    k1, k2, k3, k4 = jax.random.split(key, 4)
    bound1 = 1.0 / math.sqrt(din)
    bound2 = 1.0 / math.sqrt(hidden)
    return {
        # stored as (in_features, out_features) so the math is x @ W
        "w1": jax.random.uniform(k1, (din, hidden), dtype, -bound1, bound1),
        "b1": jax.random.uniform(k2, (hidden,), dtype, -bound1, bound1),
        "w2": jax.random.uniform(k3, (hidden, edge_size), dtype, -bound2, bound2),
        "b2": jax.random.uniform(k4, (edge_size,), dtype, -bound2, bound2),
    }


# ------------------------------- main ------------------------------------------
if __name__ == "__main__":
    node_size = 32
    edge_size = 32
    num_nodes = 16
    num_edges = 128

    key = jax.random.PRNGKey(0)
    k_params, k_edge, k_node, k_idx = jax.random.split(key, 4)

    params = init_edge_update_params(k_params, edge_size, node_size)
    # Hoisted out of the jitted forward: weight split/padding happens once.
    prep = prepare_edge_update_params(params, node_size)

    edge_state = jax.random.normal(k_edge, (num_edges, edge_size), jnp.float32)
    node_state = jax.random.normal(k_node, (num_nodes, node_size), jnp.float32)
    edges = jax.random.randint(k_idx, (num_edges, 2), 0, num_nodes, jnp.int32)

    fwd = jax.jit(functools.partial(edge_update_forward, tile_edges=2048))
    out = fwd(edge_state, edges, node_state, prep)
    out = jax.block_until_ready(out)

    # Pure-JAX reference (mirrors the PyTorch module exactly).
    gathered = node_state[edges].reshape(num_edges, 2 * node_size)
    combined = jnp.concatenate([gathered, edge_state], axis=1)
    h = jax.nn.softplus(combined @ params["w1"] + params["b1"]) - jnp.log(2.0)
    ref = h @ params["w2"] + params["b2"]

    assert out.shape == (num_edges, edge_size)
    assert jnp.allclose(out, ref, atol=1e-5, rtol=1e-5), "mismatch vs reference"

    print("KERNEL_OK")
</pallas_src>

<mosaic_0001>
module attributes {stable_mosaic.version = 11 : i64} {
  func.func @_edge_mlp_kernel(%arg0: i32, %arg1: memref<64x2xi32, #tpu.memory_space<vmem>>, %arg2: memref<64x32xf32, #tpu.memory_space<vmem>>, %arg3: memref<16x128xf32, #tpu.memory_space<vmem>>, %arg4: memref<16x128xf32, #tpu.memory_space<vmem>>, %arg5: memref<32x128xf32, #tpu.memory_space<vmem>>, %arg6: memref<1x128xf32, #tpu.memory_space<vmem>>, %arg7: memref<128x32xf32, #tpu.memory_space<vmem>>, %arg8: memref<1x32xf32, #tpu.memory_space<vmem>>, %arg9: memref<64x32xf32, #tpu.memory_space<vmem>>) attributes {dimension_semantics = [#tpu.dimension_semantics<parallel>], iteration_bounds = array<i64: 2>, scalar_prefetch = 0 : i64, scratch_operands = 0 : i64, tpu.core_type = #tpu.core_type<tc>, window_params = [{transform_indices = @transform_0, window_bounds = array<i64: 64, 2>}, {transform_indices = @transform_1, window_bounds = array<i64: 64, 32>}, {pipeline_mode = #tpu.pipeline_mode<synchronous>, transform_indices = @transform_2, window_bounds = array<i64: 16, 128>}, {pipeline_mode = #tpu.pipeline_mode<synchronous>, transform_indices = @transform_3, window_bounds = array<i64: 16, 128>}, {pipeline_mode = #tpu.pipeline_mode<synchronous>, transform_indices = @transform_4, window_bounds = array<i64: 32, 128>}, {pipeline_mode = #tpu.pipeline_mode<synchronous>, transform_indices = @transform_5, window_bounds = array<i64: 1, 128>}, {pipeline_mode = #tpu.pipeline_mode<synchronous>, transform_indices = @transform_6, window_bounds = array<i64: 128, 32>}, {pipeline_mode = #tpu.pipeline_mode<synchronous>, transform_indices = @transform_7, window_bounds = array<i64: 1, 32>}, {transform_indices = @transform_8, window_bounds = array<i64: 64, 32>}]} {
    %c0 = arith.constant 0 : index
    %c0_0 = arith.constant 0 : index
    %0 = vector.load %arg1[%c0, %c0_0] : memref<64x2xi32, #tpu.memory_space<vmem>>, vector<64x2xi32>
    %1 = tpu.iota {dimensions = array<i32: 1>} : vector<64x16xi32>
    %2 = vector.extract_strided_slice %0 {offsets = [0, 0], sizes = [64, 1], strides = [1, 1]} : vector<64x2xi32> to vector<64x1xi32>
    %3 = vector.broadcast %2 : vector<64x1xi32> to vector<64x16xi32>
    %4 = arith.cmpi eq, %3, %1 : vector<64x16xi32>
    %5 = arith.extui %4 : vector<64x16xi1> to vector<64x16xi32>
    %6 = arith.sitofp %5 : vector<64x16xi32> to vector<64x16xf32>
    %7 = vector.extract_strided_slice %0 {offsets = [0, 1], sizes = [64, 1], strides = [1, 1]} : vector<64x2xi32> to vector<64x1xi32>
    %8 = vector.broadcast %7 : vector<64x1xi32> to vector<64x16xi32>
    %9 = arith.cmpi eq, %8, %1 : vector<64x16xi32>
    %10 = arith.extui %9 : vector<64x16xi1> to vector<64x16xi32>
    %11 = arith.sitofp %10 : vector<64x16xi32> to vector<64x16xf32>
    %c0_1 = arith.constant 0 : index
    %c0_2 = arith.constant 0 : index
    %12 = vector.load %arg3[%c0_1, %c0_2] : memref<16x128xf32, #tpu.memory_space<vmem>>, vector<16x128xf32>
    %cst = arith.constant dense<0.000000e+00> : vector<64x128xf32>
    %13 = tpu.matmul %6, %12, %cst {dimension_numbers = #tpu.dot_dimension_numbers<[1], [0], [0], [1], [0, 0, 1, 1], [], []>} : vector<64x16xf32>, vector<16x128xf32>, vector<64x128xf32> -> vector<64x128xf32>
    %c0_3 = arith.constant 0 : index
    %c0_4 = arith.constant 0 : index
    %14 = vector.load %arg4[%c0_3, %c0_4] : memref<16x128xf32, #tpu.memory_space<vmem>>, vector<16x128xf32>
    %cst_5 = arith.constant dense<0.000000e+00> : vector<64x128xf32>
    %15 = tpu.matmul %11, %14, %cst_5 {dimension_numbers = #tpu.dot_dimension_numbers<[1], [0], [0], [1], [0, 0, 1, 1], [], []>} : vector<64x16xf32>, vector<16x128xf32>, vector<64x128xf32> -> vector<64x128xf32>
    %16 = arith.addf %13, %15 : vector<64x128xf32>
    %c0_6 = arith.constant 0 : index
    %c0_7 = arith.constant 0 : index
    %17 = vector.load %arg2[%c0_6, %c0_7] : memref<64x32xf32, #tpu.memory_space<vmem>>, vector<64x32xf32>
    %c0_8 = arith.constant 0 : index
    %c0_9 = arith.constant 0 : index
    %18 = vector.load %arg5[%c0_8, %c0_9] : memref<32x128xf32, #tpu.memory_space<vmem>>, vector<32x128xf32>
    %cst_10 = arith.constant dense<0.000000e+00> : vector<64x128xf32>
    %19 = tpu.matmul %17, %18, %cst_10 {dimension_numbers = #tpu.dot_dimension_numbers<[1], [0], [0], [1], [0, 0, 1, 1], [], []>} : vector<64x32xf32>, vector<32x128xf32>, vector<64x128xf32> -> vector<64x128xf32>
    %20 = arith.addf %16, %19 : vector<64x128xf32>
    %c0_11 = arith.constant 0 : index
    %c0_12 = arith.constant 0 : index
    %21 = vector.load %arg6[%c0_11, %c0_12] : memref<1x128xf32, #tpu.memory_space<vmem>>, vector<1x128xf32>
    %22 = vector.broadcast %21 : vector<1x128xf32> to vector<64x128xf32>
    %23 = arith.addf %20, %22 : vector<64x128xf32>
    %cst_13 = arith.constant 0.000000e+00 : f32
    %24 = vector.broadcast %cst_13 : f32 to vector<64x128xf32>
    %25 = arith.maximumf %23, %24 : vector<64x128xf32>
    %26 = math.absf %23 : vector<64x128xf32>
    %cst_14 = arith.constant 0.000000e+00 : f32
    %27 = vector.broadcast %cst_14 : f32 to vector<64x128xf32>
    %28 = arith.subf %27, %26 : vector<64x128xf32>
    %29 = math.exp %28 : vector<64x128xf32>
    %30 = math.log1p %29 : vector<64x128xf32>
    %31 = arith.addf %25, %30 : vector<64x128xf32>
    %cst_15 = arith.constant 0.693147182 : f32
    %32 = vector.broadcast %cst_15 : f32 to vector<64x128xf32>
    %33 = arith.subf %31, %32 : vector<64x128xf32>
    %c0_16 = arith.constant 0 : index
    %c0_17 = arith.constant 0 : index
    %34 = vector.load %arg7[%c0_16, %c0_17] : memref<128x32xf32, #tpu.memory_space<vmem>>, vector<128x32xf32>
    %cst_18 = arith.constant dense<0.000000e+00> : vector<64x32xf32>
    %35 = tpu.matmul %33, %34, %cst_18 {dimension_numbers = #tpu.dot_dimension_numbers<[1], [0], [0], [1], [0, 0, 1, 1], [], []>} : vector<64x128xf32>, vector<128x32xf32>, vector<64x32xf32> -> vector<64x32xf32>
    %c0_19 = arith.constant 0 : index
    %c0_20 = arith.constant 0 : index
    %36 = vector.load %arg8[%c0_19, %c0_20] : memref<1x32xf32, #tpu.memory_space<vmem>>, vector<1x32xf32>
    %37 = vector.broadcast %36 : vector<1x32xf32> to vector<64x32xf32>
    %38 = arith.addf %35, %37 : vector<64x32xf32>
    %c0_21 = arith.constant 0 : index
    %c0_22 = arith.constant 0 : index
    %39 = vector.load %arg9[%c0_21, %c0_22] : memref<64x32xf32, #tpu.memory_space<vmem>>, vector<64x32xf32>
    tpu.vector_store %arg9[%c0_21, %c0_22], %38 {strides = array<i32>} : memref<64x32xf32, #tpu.memory_space<vmem>>, vector<64x32xf32>,
    return
  }
  func.func @transform_0(%arg0: i32) -> (i32, i32) {
    %c0_i32 = arith.constant 0 : i32
    %c0_i32_0 = arith.constant 0 : i32
    return %arg0, %c0_i32 : i32, i32
  }
  func.func @transform_1(%arg0: i32) -> (i32, i32) {
    %c0_i32 = arith.constant 0 : i32
    %c0_i32_0 = arith.constant 0 : i32
    return %arg0, %c0_i32 : i32, i32
  }
  func.func @transform_2(%arg0: i32) -> (i32, i32) {
    %c0_i32 = arith.constant 0 : i32
    %c0_i32_0 = arith.constant 0 : i32
    %c0_i32_1 = arith.constant 0 : i32
    return %c0_i32, %c0_i32_0 : i32, i32
  }
  func.func @transform_3(%arg0: i32) -> (i32, i32) {
    %c0_i32 = arith.constant 0 : i32
    %c0_i32_0 = arith.constant 0 : i32
    %c0_i32_1 = arith.constant 0 : i32
    return %c0_i32, %c0_i32_0 : i32, i32
  }
  func.func @transform_4(%arg0: i32) -> (i32, i32) {
    %c0_i32 = arith.constant 0 : i32
    %c0_i32_0 = arith.constant 0 : i32
    %c0_i32_1 = arith.constant 0 : i32
    return %c0_i32, %c0_i32_0 : i32, i32
  }
  func.func @transform_5(%arg0: i32) -> (i32, i32) {
    %c0_i32 = arith.constant 0 : i32
    %c0_i32_0 = arith.constant 0 : i32
    %c0_i32_1 = arith.constant 0 : i32
    return %c0_i32, %c0_i32_0 : i32, i32
  }
  func.func @transform_6(%arg0: i32) -> (i32, i32) {
    %c0_i32 = arith.constant 0 : i32
    %c0_i32_0 = arith.constant 0 : i32
    %c0_i32_1 = arith.constant 0 : i32
    return %c0_i32, %c0_i32_0 : i32, i32
  }
  func.func @transform_7(%arg0: i32) -> (i32, i32) {
    %c0_i32 = arith.constant 0 : i32
    %c0_i32_0 = arith.constant 0 : i32
    %c0_i32_1 = arith.constant 0 : i32
    return %c0_i32, %c0_i32_0 : i32, i32
  }
  func.func @transform_8(%arg0: i32) -> (i32, i32) {
    %c0_i32 = arith.constant 0 : i32
    %c0_i32_0 = arith.constant 0 : i32
    return %arg0, %c0_i32 : i32, i32
  }
}

</mosaic_0001>

<bundles_post_ra>
// kernel: edge_update_forward.1
= control target key start
LH: loop header
LB: loop body
LE: loop exit
PB: predicated region body
PF: predicated region fallthrough
CT: control target
= control target key end

     0   :  { %s1580_s27 = smov 0   ;;  %s1833_s0 = inlined_call_operand.vmem [shape: s32[128,2], index: 0, kind: input, shape index: {}]   ;;  %s1834_s1 = inlined_call_operand.vmem [shape: f32[128,32], index: 1, kind: input, shape index: {}]   ;;  %s1835_s2 = inlined_call_operand.vmem [shape: f32[16,128], index: 2, kind: input, shape index: {}]   ;;  %s1836_s3 = inlined_call_operand.vmem [shape: f32[16,128], index: 3, kind: input, shape index: {}]   ;;  %s1837_s4 = inlined_call_operand.vmem [shape: f32[32,128], index: 4, kind: input, shape index: {}]   ;;  %s1838_s5 = inlined_call_operand.vmem [shape: f32[1,128], index: 5, kind: input, shape index: {}]   ;;  %s1839_s6 = inlined_call_operand.vmem [shape: f32[128,32], index: 6, kind: input, shape index: {}]   ;;  %s1840_s7 = inlined_call_operand.vmem [shape: f32[1,32], index: 7, kind: input, shape index: {}]   ;;  %s1841_s8 = inlined_call_operand.vmem [shape: f32[128,32], index: 8, kind: output, shape index: {}]  }
   0x1 LB: > { %s1197_s28 = sadd.s32 4294967295, %s1530_s27   ;;  %p1201_p0 = scmp.ge.s32.totalorder %s1530_s27, 1  ;;  %s1530_s27 = sphi %s1580_s27, %s18_s27  }
   0x2   : > { %p274_p1 = scmp.lt.s32.totalorder %s1530_s27, 3 }
   0x4   : > { %p275_p2 = pnand %p1201_p0, %p274_p1 }
   0x5   : > { %s1202_s29 = sshll.u32 (!%p275_p2), %s1197_s28, 3  ;;  %v1532_v0 = vmov (!%p275_p2), 1   ;;  %v439_v5 = vld [vmem:[%s1836_s3] sm:$0xff] (!%p275_p2)  ;;  %v440_v6 = vld [vmem:[%s1836_s3 + $0x8] sm:$0xff] (!%p275_p2)  ;;  %v1533_v15 = vmov (!%p275_p2), 0   ;;  %v339_v16 = vlaneseq (!%p275_p2)  ;;  %vm441_vm0 = vcmask (!%p275_p2), 130048  }
   0x6   : > { %278 = sbr.rel (%p275_p2) target bundleno = 664 (0x298), region = 52  ;;  %1488 = vset.pattern.permute.xlu1 (!%p275_p2), %v1532_v0  ;;  %1487 = vset.pattern.permute.xlu0 (!%p275_p2), %v1532_v0  ;;  %p314_p3 = scmp.lt.s32.totalorder (!%p275_p2), %s1202_s29, 15  ;;  %v1412_v7 = vpack.c.bf16 (!%p275_p2), %v440_v6, %v439_v5  ;;  %v437_v10 = vld [vmem:[%s1835_s2] sm:$0xff] (!%p275_p2)  ;;  %v438_v11 = vld [vmem:[%s1835_s2 + $0x8] sm:$0xff] (!%p275_p2)  ;;  %v1534_v20 = vmov (!%p275_p2), 0.0   ;;  %v710_v40 = vld [vmem:[%s1837_s4 + $0x10] sm:$0xff] (!%p275_p2) }
   0x7   : > { %v1416_v12 = vpack.c.bf16 (!%p275_p2), %v438_v11, %v437_v10  ;;  %v1606_v17 = vand.u32 (!%p275_p2), 127, %v339_v16  ;;  %v708_v22 = vld [vmem:[%s1837_s4] sm:$0xff] (!%p275_p2)  ;;  %v709_v23 = vld [vmem:[%s1837_s4 + $0x8] sm:$0xff] (!%p275_p2)  ;;  %v711_v41 = vld [vmem:[%s1837_s4 + $0x18] sm:$0xff] (!%p275_p2) }
   0x8   : > { %1413 = vmatprep.subr.bf16.mxu0 (!%p275_p2), %v1412_v7  ;;  %v1420_v26 = vpack.c.bf16 (!%p275_p2), %v709_v23, %v708_v22  ;;  %v1424_v46 = vpack.c.bf16 (!%p275_p2), %v711_v41, %v710_v40  ;;  %v996_v5 = vld [vmem:[%s1839_s6 + $0x18] sm:$0xff] (!%p275_p2)  ;;  %v999_v10 = vld [vmem:[%s1839_s6 + $0x30] sm:$0xff] (!%p275_p2) }
   0x9   : > { %1415 = vmatpush3.bf16.msra.mxu0 (!%p275_p2), %v1412_v7  ;;  %v997_v7 = vld [vmem:[%s1839_s6 + $0x20] sm:$0xff] (!%p275_p2)  ;;  %v1000_v11 = vld [vmem:[%s1839_s6 + $0x38] sm:$0xff] (!%p275_p2)  ;;  %v1007_v22 = vld [vmem:[%s1839_s6 + $0x70] sm:$0xff] (!%p275_p2) }
   0xa   : > { %1417 = vmatprep.subr.bf16.mxu0 (!%p275_p2), %v1416_v12  ;;  %v1008_v23 = vld [vmem:[%s1839_s6 + $0x78] sm:$0xff] (!%p275_p2) }
   0xd   : > { %s1849_s29 = smov (!%p314_p3, %s1202_s29), 15 }
   0xe   : > { %s1588_s30 = sshll.u32 %s1849_s29, 3 }
   0xf   : > { %s317_s11 = scalar_lea.vmem %s1833_s0, %s1588_s30  ;;  %s323_s10 = scalar_lea.vmem %s1834_s1, %s1588_s30 }
  0x10   : > { %v333_v1 = vld [vmem:[%s317_s11 + $0x10] sm:$0xff]  ;;  %v331_v2 = vld [vmem:[%s317_s11] sm:$0xff]  ;;  %v334_v3 = vld [vmem:[%s317_s11 + $0x18] sm:$0xff]  ;;  %s329_s9 = scalar_lea.vmem %s1841_s8, %s1588_s30 }
  0x11   : > { %396 = vperm.xlu1 %1488, %v333_v1   ;;  %390 = vperm.xlu0 %1487, %v331_v2   ;;  %v332_v4 = vld [vmem:[%s317_s11 + $0x8] sm:$0xff]  ;;  %v335_v9 = vld [vmem:[%s317_s11 + $0x20] sm:$0xff]  ;;  %v338_v13 = vld [vmem:[%s317_s11 + $0x38] sm:$0xff] }
  0x12   : > { %v336_v8 = vld [vmem:[%s317_s11 + $0x28] sm:$0xff]  ;;  %v337_v14 = vld [vmem:[%s317_s11 + $0x30] sm:$0xff]  ;;  %v700_v56 = vld [vmem:[%s323_s10] sm:$0xff] }
  0x13   : > { %v701_v58 = vld [vmem:[%s323_s10 + $0x8] sm:$0xff]  ;;  %v702_v59 = vld [vmem:[%s323_s10 + $0x10] sm:$0xff]  ;;  %v703_v60 = vld [vmem:[%s323_s10 + $0x18] sm:$0xff] }
  0x14   : > { %v704_v61 = vld [vmem:[%s323_s10 + $0x20] sm:$0xff]  ;;  %v705_v62 = vld [vmem:[%s323_s10 + $0x28] sm:$0xff]  ;;  %v706_v63 = vld [vmem:[%s323_s10 + $0x30] sm:$0xff] }
  0x15   : > { %399 = vperm.xlu1 %1488, %v334_v3   ;;  %393 = vperm.xlu0 %1487, %v332_v4  }
  0x19   : > { %405 = vperm.xlu1 %1488, %v336_v8   ;;  %402 = vperm.xlu0 %1487, %v335_v9  }
  0x1d   : > { %411 = vperm.xlu1 %1488, %v338_v13   ;;  %408 = vperm.xlu0 %1487, %v337_v14  }
  0x21   : > { %1490 = vset.pattern.permute.xlu1 %v1533_v15  ;;  %1489 = vset.pattern.permute.xlu0 %v1533_v15  ;;  %v1003_v15 = vld [vmem:[%s1839_s6 + $0x50] sm:$0xff] }
  0x22   : > { %345 = vperm.xlu1 %1490, %v332_v4   ;;  %342 = vperm.xlu0 %1489, %v331_v2   ;;  %v994_v2 = vld [vmem:[%s1839_s6 + $0x8] sm:$0xff]  ;;  %v995_v4 = vld [vmem:[%s1839_s6 + $0x10] sm:$0xff] }
  0x23   : > { %v1432_v6 = vpack.c.bf16 %v996_v5, %v995_v4 }
  0x26   : > { %348 = vperm.xlu1 %1490, %v333_v1   ;;  %351 = vperm.xlu0 %1489, %v334_v3   ;;  %v993_v1 = vld [vmem:[%s1839_s6] sm:$0xff] }
  0x27   : > { %v1428_v3 = vpack.c.bf16 %v994_v2, %v993_v1 }
  0x29   : > { %1429 = vmatprep.subr.bf16.mxu1 %v1428_v3 }
  0x2a   : > { %354 = vperm.xlu1 %1490, %v335_v9   ;;  %357 = vperm.xlu0 %1489, %v336_v8   ;;  %v998_v8 = vld [vmem:[%s1839_s6 + $0x28] sm:$0xff] }
  0x2b   : > { %1431 = vmatpush3.bf16.msra.mxu1 %v1428_v3  ;;  %v1436_v9 = vpack.c.bf16 %v998_v8, %v997_v7 }
  0x2c   : > { %1433 = vmatprep.subr.bf16.mxu1 %v1432_v6 }
  0x2e   : > { %360 = vperm.xlu1 %1490, %v337_v14   ;;  %363 = vperm.xlu0 %1489, %v338_v13   ;;  %v1001_v13 = vld [vmem:[%s1839_s6 + $0x40] sm:$0xff]  ;;  %v1002_v14 = vld [vmem:[%s1839_s6 + $0x48] sm:$0xff] }
  0x2f   : > { %1435 = vmatpush3.bf16.msra.mxu1 %v1432_v6  ;;  %v1444_v16 = vpack.c.bf16 %v1002_v14, %v1001_v13 }
  0x30   : > { %1437 = vmatprep.subr.bf16.mxu1 %v1436_v9 }
  0x32   : > { %1491 = vset.pattern.permute.xlu0 %v1532_v0  ;;  %v707_v0 = vld [vmem:[%s323_s10 + $0x38] sm:$0xff] }
  0x33   : > { %1439 = vmatpush3.bf16.msra.mxu1 %v1436_v9 }
  0x90   : > { %v397_v18 = vpop.permute.xlu1 %396  ;;  %v391_v19 = vpop.permute.xlu0 %390 }
  0x91   : > { %vm413_vm1 = vcmp.eq.s32.totalorder %v391_v19, %v1606_v17  ;;  %vm415_vm2 = vcmp.eq.s32.totalorder %v397_v18, %v1606_v17  ;;  %v1005_v19 = vld [vmem:[%s1839_s6 + $0x60] sm:$0xff] }
  0x92   : > { %v1216_v21 = vsel %vm413_vm1, 1.0, %v1534_v20  ;;  %v1218_v28 = vsel %vm415_vm2, 1.0, %v1534_v20  ;;  %vm712_vm2 = vcmask 261120  }
  0x93   : > { %1320 = vmatprep.mubr.msk.f32.mxu0 %vm441_vm0, %v1216_v21 }
  0x94   : > { %v400_v24 = vpop.permute.xlu1 %399  ;;  %v394_v25 = vpop.permute.xlu0 %393 }
  0x95   : > { %vm414_vm3 = vcmp.eq.s32.totalorder %v394_v25, %v1606_v17  ;;  %vm416_vm4 = vcmp.eq.s32.totalorder %v400_v24, %v1606_v17  ;;  %v1456_v24 = vpack.c.bf16 %v1008_v23, %v1007_v22  ;;  %v1248_v25 = vld [vmem:[%s1838_s5] ss:$0 sm:$0xff] }
  0x96   : > { %v1217_v27 = vsel %vm414_vm3, 1.0, %v1534_v20  ;;  %v1219_v31 = vsel %vm416_vm4, 1.0, %v1534_v20 }
  0x97   : > { %1321 = vmatmul.mubr.msk.f32.vlgmr.msra.gmra.mrb[0].mxu0 %vm441_vm0, %v1217_v27 }
  0x98   : > { %1419 = vmatpush3.bf16.msra.mxu0 %v1416_v12  ;;  %v406_v29 = vpop.permute.xlu1 %405  ;;  %1323 = vmatprep.mubr.msk.f32.mxu0 %vm441_vm0, %v1218_v28  ;;  %v403_v30 = vpop.permute.xlu0 %402  ;;  %v1440_v12 = vpack.c.bf16 %v1000_v11, %v999_v10 }
  0x99   : > { %vm417_vm5 = vcmp.eq.s32.totalorder %v403_v30, %v1606_v17  ;;  %1421 = vmatprep.subr.bf16.mxu0 %v1420_v26  ;;  %vm418_vm6 = vcmp.eq.s32.totalorder %v406_v29, %v1606_v17 }
  0x9a   : > { %v1220_v32 = vsel %vm417_vm5, 1.0, %v1534_v20  ;;  %v1221_v35 = vsel %vm418_vm6, 1.0, %v1534_v20  ;;  %1441 = vmatprep.subr.bf16.mxu1 %v1440_v12 }
  0x9b   : > { %1324 = vmatmul.mubr.msk.f32.gmra.mrb[2].mxu0 %vm441_vm0, %v1219_v31  ;;  %1443 = vmatpush3.bf16.msra.mxu1 %v1440_v12 }
  0x9c   : > { %v412_v33 = vpop.permute.xlu1 %411  ;;  %1326 = vmatprep.mubr.msk.f32.mxu0 %vm441_vm0, %v1220_v32  ;;  %v409_v34 = vpop.permute.xlu0 %408  ;;  %1445 = vmatprep.subr.bf16.mxu1 %v1444_v16 }
  0x9d   : > { %vm419_vm7 = vcmp.eq.s32.totalorder %v409_v34, %v1606_v17  ;;  %vm420_vm8 = vcmp.eq.s32.totalorder %v412_v33, %v1606_v17 }
  0x9e   : > { %v1222_v36 = vsel %vm419_vm7, 1.0, %v1534_v20  ;;  %v1223_v39 = vsel %vm420_vm8, 1.0, %v1534_v20 }
  0x9f   : > { %1327 = vmatmul.mubr.msk.f32.gmra.mrb[4].mxu0 %vm441_vm0, %v1221_v35  ;;  %1447 = vmatpush3.bf16.msra.mxu1 %v1444_v16 }
  0xa0   : > { %1329 = vmatprep.mubr.msk.f32.mxu0 %vm441_vm0, %v1222_v36 }
  0xa1   : > { %v346_v37 = vpop.permute.xlu1 %345  ;;  %v343_v38 = vpop.permute.xlu0 %342 }
  0xa2   : > { %vm366_vm9 = vcmp.eq.s32.totalorder %v346_v37, %v1606_v17  ;;  %vm365_vm10 = vcmp.eq.s32.totalorder %v343_v38, %v1606_v17 }
  0xa3   : > { %v1208_v42 = vsel %vm365_vm10, 1.0, %v1534_v20  ;;  %1330 = vmatmul.mubr.msk.f32.gmra.mrb[6].mxu0 %vm441_vm0, %v1223_v39  ;;  %v1209_v43 = vsel %vm366_vm9, 1.0, %v1534_v20 }
  0xa4   : > { %1336 = vmatprep.mubr.msk.f32.mxu0 %vm441_vm0, %v1208_v42 }
  0xa5   : > { %v349_v44 = vpop.permute.xlu1 %348  ;;  %v352_v45 = vpop.permute.xlu0 %351 }
  0xa6   : > { %vm367_vm11 = vcmp.eq.s32.totalorder %v349_v44, %v1606_v17  ;;  %vm368_vm12 = vcmp.eq.s32.totalorder %v352_v45, %v1606_v17 }
  0xa7   : > { %v1210_v47 = vsel %vm367_vm11, 1.0, %v1534_v20  ;;  %1337 = vmatmul.mubr.msk.f32.vlgmr.msra.gmra.mrb[0].mxu0 %vm441_vm0, %v1209_v43  ;;  %v1211_v50 = vsel %vm368_vm12, 1.0, %v1534_v20 }
  0xa8   : > { %1423 = vmatpush3.bf16.msra.mxu0 %v1420_v26  ;;  %1339 = vmatprep.mubr.msk.f32.mxu0 %vm441_vm0, %v1210_v47 }
  0xa9   : > { %v355_v48 = vpop.permute.xlu1 %354  ;;  %v358_v49 = vpop.permute.xlu0 %357  ;;  %1425 = vmatprep.subr.bf16.mxu0 %v1424_v46 }
  0xaa   : > { %vm369_vm13 = vcmp.eq.s32.totalorder %v355_v48, %v1606_v17  ;;  %vm370_vm14 = vcmp.eq.s32.totalorder %v358_v49, %v1606_v17 }
  0xab   : > { %v1212_v51 = vsel %vm369_vm13, 1.0, %v1534_v20  ;;  %1340 = vmatmul.mubr.msk.f32.gmra.mrb[2].mxu0 %vm441_vm0, %v1211_v50  ;;  %v1213_v54 = vsel %vm370_vm14, 1.0, %v1534_v20 }
  0xac   : > { %1342 = vmatprep.mubr.msk.f32.mxu0 %vm441_vm0, %v1212_v51  ;;  %1427 = vmatpush3.bf16.msra.mxu0 %v1424_v46 }
  0xad   : > { %v361_v52 = vpop.permute.xlu1 %360  ;;  %v364_v53 = vpop.permute.xlu0 %363 }
  0xae   : > { %vm371_vm15 = vcmp.eq.s32.totalorder %v361_v52, %v1606_v17  ;;  %vm372_vm1 = vcmp.eq.s32.totalorder %v364_v53, %v1606_v17  ;;  %v1004_v17 = vld [vmem:[%s1839_s6 + $0x58] sm:$0xff] }
  0xaf   : > { %v1214_v55 = vsel %vm371_vm15, 1.0, %v1534_v20  ;;  %1343 = vmatmul.mubr.msk.f32.gmra.mrb[4].mxu0 %vm441_vm0, %v1213_v54  ;;  %v1215_v57 = vsel %vm372_vm1, 1.0, %v1534_v20  ;;  %v1448_v18 = vpack.c.bf16 %v1004_v17, %v1003_v15  ;;  %v1006_v20 = vld [vmem:[%s1839_s6 + $0x68] sm:$0xff] }
  0xb0   : > { %1345 = vmatprep.mubr.msk.f32.mxu0 %vm441_vm0, %v1214_v55  ;;  %v1452_v21 = vpack.c.bf16 %v1006_v20, %v1005_v19 }
  0xb1   : > { %1449 = vmatprep.subr.bf16.mxu1 %v1448_v18 }
  0xb2   : > { %1451 = vmatpush3.bf16.msra.mxu1 %v1448_v18 }
  0xb3   : > { %1346 = vmatmul.mubr.msk.f32.gmra.mrb[6].mxu0 %vm441_vm0, %v1215_v57  ;;  %1453 = vmatprep.subr.bf16.mxu1 %v1452_v21 }
  0xb4   : > { %1356 = vmatprep.mubr.msk.f32.mxu0 %vm712_vm2, %v700_v56 }
  0xb6   : > { %1455 = vmatpush3.bf16.msra.mxu1 %v1452_v21 }
  0xb7   : > { %1357 = vmatmul.mubr.msk.f32.vlgmr.msra.gmra.mrb[0].mxu0 %vm712_vm2, %v701_v58  ;;  %1457 = vmatprep.subr.bf16.mxu1 %v1456_v24 }
  0xb8   : > { %1359 = vmatprep.mubr.msk.f32.mxu0 %vm712_vm2, %v702_v59 }
  0xba   : > { %1459 = vmatpush3.bf16.msra.mxu1 %v1456_v24 }
  0xbb   : > { %1360 = vmatmul.mubr.msk.f32.gmra.mrb[2].mxu0 %vm712_vm2, %v703_v60 }
  0xbc   : > { %1362 = vmatprep.mubr.msk.f32.mxu0 %vm712_vm2, %v704_v61 }
  0xbf   : > { %1363 = vmatmul.mubr.msk.f32.gmra.mrb[4].mxu0 %vm712_vm2, %v705_v62 }
  0xc0   : > { %1365 = vmatprep.mubr.msk.f32.mxu0 %vm712_vm2, %v706_v63 }
  0xc3   : > { %1366 = vmatmul.mubr.msk.f32.gmra.mrb[6].mxu0 %vm712_vm2, %v707_v0 }
 0x18a   : > { %v1358_v26 = vpop.f32.mrb[0].mxu0 }
 0x18b   : > { %v1731_v27 = vadd.f32 %v1358_v26, %v1248_v25  ;;  %v803_v28 = vpop.f32.mrb[1].mxu0 }
 0x18c   : > { %v1733_v29 = vadd.f32 %v1248_v25, %v803_v28 }
 0x18d   : > { %v874_v30 = vand.u32 2147483647, %v1731_v27  ;;  %v866_v13 = vmax.f32 %v1731_v27, 0.0 }
 0x18e   : > { %v873_v31 = vand.u32 2147483647, %v1733_v29  ;;  %v1361_v32 = vpop.f32.mrb[2].mxu0  ;;  %v865_v16 = vmax.f32 %v1733_v29, 0.0 }
 0x18f   : > { %v882_v33 = vsub.f32 0.0, %v874_v30  ;;  %v1737_v34 = vadd.f32 %v1361_v32, %v1248_v25  ;;  %v813_v35 = vpop.f32.mrb[3].mxu0 }
 0x190   : > { %v881_v36 = vsub.f32 0.0, %v873_v31  ;;  %v1739_v37 = vadd.f32 %v1248_v25, %v813_v35 }
 0x191   : > { %v891_v38 = vmul.f32 1.442695, %v882_v33  ;;  %v876_v39 = vand.u32 2147483647, %v1737_v34  ;;  %v868_v24 = vmax.f32 %v1737_v34, 0.0 }
 0x192   : > { %v889_v40 = vmul.f32 1.442695, %v881_v36  ;;  %v875_v41 = vand.u32 2147483647, %v1739_v37  ;;  %v1364_v42 = vpop.f32.mrb[4].mxu0 }
 0x193   : > { %1492 = vpow2.f32 %v891_v38  ;;  %v884_v43 = vsub.f32 0.0, %v876_v39  ;;  %v1743_v44 = vadd.f32 %v1364_v42, %v1248_v25  ;;  %v823_v45 = vpop.f32.mrb[5].mxu0 }
 0x194   : > { %1494 = vpow2.f32 %v889_v40  ;;  %v883_v46 = vsub.f32 0.0, %v875_v41  ;;  %v1745_v47 = vadd.f32 %v1248_v25, %v823_v45 }
 0x195   : > { %v895_v48 = vmul.f32 1.442695, %v884_v43  ;;  %v878_v49 = vand.u32 2147483647, %v1743_v44  ;;  %v870_v26 = vmax.f32 %v1743_v44, 0.0 }
 0x196   : > { %v893_v50 = vmul.f32 1.442695, %v883_v46  ;;  %v877_v51 = vand.u32 2147483647, %v1745_v47  ;;  %v1367_v52 = vpop.f32.mrb[6].mxu0  ;;  %v869_v28 = vmax.f32 %v1745_v47, 0.0 }
 0x197   : > { %1496 = vpow2.f32 %v895_v48  ;;  %v886_v53 = vsub.f32 0.0, %v878_v49  ;;  %v1749_v54 = vadd.f32 %v1367_v52, %v1248_v25  ;;  %v833_v55 = vpop.f32.mrb[7].mxu0 }
 0x198   : > { %1498 = vpow2.f32 %v893_v50  ;;  %v885_v56 = vsub.f32 0.0, %v877_v51  ;;  %v1751_v57 = vadd.f32 %v1248_v25, %v833_v55  ;;  %v867_v25 = vmax.f32 %v1739_v37, 0.0 }
 0x199   : > { %v899_v58 = vmul.f32 1.442695, %v886_v53  ;;  %v880_v59 = vand.u32 2147483647, %v1749_v54 }
 0x19a   : > { %v897_v60 = vmul.f32 1.442695, %v885_v56  ;;  %v879_v61 = vand.u32 2147483647, %v1751_v57 }
 0x19b   : > { %1500 = vpow2.f32 %v899_v58  ;;  %v888_v62 = vsub.f32 0.0, %v880_v59 }
 0x19c   : > { %1502 = vpow2.f32 %v897_v60  ;;  %v887_v63 = vsub.f32 0.0, %v879_v61 }
 0x19d   : > { %v1493_v0 = vpop.eup %1492  ;;  %v903_v1 = vmul.f32 1.442695, %v888_v62 }
 0x19e   : > { %v1495_v2 = vpop.eup %1494  ;;  %v901_v3 = vmul.f32 1.442695, %v887_v63  ;;  %v914_v4 = vadd.f32 1.0, %v1493_v0  ;;  %v917_v10 = vmul.f32 -0.5, %v1493_v0  ;;  %v920_v17 = vand.u32 2147483647, %v1493_v0 }
 0x19f   : > { %1504 = vpow2.f32 %v903_v1  ;;  %v905_v5 = vadd.f32 1.0, %v1495_v2  ;;  %v908_v9 = vmul.f32 -0.5, %v1495_v2  ;;  %v911_v21 = vand.u32 2147483647, %v1495_v2 }
 0x1a0   : > { %1506 = vpow2.f32 %v901_v3  ;;  %v918_v22 = vadd.f32 1.0, %v917_v10  ;;  %vm1775_vm0 = vcmp.lt.f32.partialorder %v920_v17, 0.0004427343 }
 0x1a1   : > { %v1497_v6 = vpop.eup %1496  ;;  %1508 = vlog2.f32 %v905_v5  ;;  %v909_v20 = vadd.f32 1.0, %v908_v9  ;;  %vm1781_vm3 = vcmp.lt.f32.partialorder %v911_v21, 0.0004427343 }
 0x1a2   : > { %v1755_v7 = vpop.eup %1498  ;;  %1510 = vlog2.f32 %v914_v4  ;;  %v932_v8 = vadd.f32 1.0, %v1497_v6  ;;  %v935_v14 = vmul.f32 -0.5, %v1497_v6  ;;  %v938_v30 = vand.u32 2147483647, %v1497_v6 }
 0x1a3   : > { %v923_v11 = vadd.f32 1.0, %v1755_v7  ;;  %v926_v18 = vmul.f32 -0.5, %v1755_v7  ;;  %v910_v37 = vmul.f32 %v1495_v2, %v909_v20  ;;  %v919_v39 = vmul.f32 %v1493_v0, %v918_v22 }
 0x1a4   : > { %1512 = vlog2.f32 %v932_v8  ;;  %v936_v29 = vadd.f32 1.0, %v935_v14  ;;  %v929_v43 = vand.u32 2147483647, %v1755_v7  ;;  %vm1788_vm4 = vcmp.lt.f32.partialorder %v938_v30, 0.0004427343 }
 0x1a5   : > { %v1758_v12 = vpop.eup %1500  ;;  %1514 = vlog2.f32 %v923_v11  ;;  %v927_v33 = vadd.f32 1.0, %v926_v18 }
 0x1a6   : > { %v1761_v15 = vpop.eup %1502  ;;  %v950_v19 = vadd.f32 1.0, %v1758_v12  ;;  %v953_v34 = vmul.f32 -0.5, %v1758_v12  ;;  %v937_v48 = vmul.f32 %v1497_v6, %v936_v29  ;;  %v956_v55 = vand.u32 2147483647, %v1758_v12 }
 0x1a7   : > { %v941_v23 = vadd.f32 1.0, %v1761_v15  ;;  %v944_v45 = vmul.f32 -0.5, %v1761_v15  ;;  %v928_v52 = vmul.f32 %v1755_v7, %v927_v33  ;;  %vm930_vm5 = vcmp.lt.f32.partialorder %v929_v43, 0.0004427343 }
 0x1a8   : > { %1516 = vlog2.f32 %v950_v19  ;;  %v954_v53 = vadd.f32 1.0, %v953_v34  ;;  %v947_v4 = vand.u32 2147483647, %v1761_v15  ;;  %vm957_vm6 = vcmp.lt.f32.partialorder %v956_v55, 0.0004427343 }
 0x1a9   : > { %v1770_v27 = vpop.eup %1504  ;;  %1518 = vlog2.f32 %v941_v23  ;;  %v945_v0 = vadd.f32 1.0, %v944_v45  ;;  %v872_v33 = vmax.f32 %v1749_v54, 0.0  ;;  %v1257_v54 = vld [vmem:[%s1840_s7] ss:$0 sm:$0xff] }
 0x1aa   : > { %v1773_v31 = vpop.eup %1506  ;;  %v968_v35 = vadd.f32 1.0, %v1770_v27  ;;  %v971_v61 = vmul.f32 -0.5, %v1770_v27  ;;  %v955_v9 = vmul.f32 %v1758_v12, %v954_v53  ;;  %v974_v19 = vand.u32 2147483647, %v1770_v27 }
 0x1ab   : > { %v1509_v36 = vpop.eup %1508  ;;  %v959_v40 = vadd.f32 1.0, %v1773_v31  ;;  %v962_v1 = vmul.f32 -0.5, %v1773_v31  ;;  %v946_v17 = vmul.f32 %v1761_v15, %v945_v0  ;;  %vm948_vm7 = vcmp.lt.f32.partialorder %v947_v4, 0.0004427343 }
 0x1ac   : > { %v1511_v41 = vpop.eup %1510  ;;  %v907_v42 = vmul.f32 0.6931472, %v1509_v36  ;;  %1520 = vlog2.f32 %v968_v35  ;;  %v972_v14 = vadd.f32 1.0, %v971_v61  ;;  %v965_v22 = vand.u32 2147483647, %v1773_v31 }
 0x1ad   : > { %v916_v46 = vmul.f32 0.6931472, %v1511_v41  ;;  %1522 = vlog2.f32 %v959_v40  ;;  %v963_v18 = vadd.f32 1.0, %v962_v1  ;;  %vm975_vm8 = vcmp.lt.f32.partialorder %v974_v19, 0.0004427343 }
 0x1ae   : > { %v1513_v50 = vpop.eup %1512  ;;  %v913_v51 = vsel %vm1781_vm3, %v910_v37, %v907_v42  ;;  %v973_v32 = vmul.f32 %v1770_v27, %v972_v14  ;;  %v871_v36 = vmax.f32 %v1751_v57, 0.0  ;;  %vm966_vm9 = vcmp.lt.f32.partialorder %v965_v22, 0.0004427343 }
 0x1af   : > { %v1515_v56 = vpop.eup %1514  ;;  %v977_v58 = vadd.f32 %v913_v51, %v865_v16  ;;  %v922_v59 = vsel %vm1775_vm0, %v919_v39, %v916_v46  ;;  %v934_v60 = vmul.f32 0.6931472, %v1513_v50  ;;  %v964_v35 = vmul.f32 %v1773_v31, %v963_v18 }
 0x1b0   : > { %v978_v62 = vadd.f32 %v922_v59, %v866_v13  ;;  %v925_v63 = vmul.f32 0.6931472, %v1515_v56 }
 0x1b1   : > { %v1249_v2 = vadd.f32 -0.6931472, %v977_v58  ;;  %v940_v3 = vsel %vm1788_vm4, %v937_v48, %v934_v60 }
 0x1b2   : > { %v1517_v5 = vpop.eup %1516  ;;  %v1250_v6 = vadd.f32 -0.6931472, %v978_v62  ;;  %v931_v7 = vsel %vm930_vm5, %v928_v52, %v925_v63  ;;  %v980_v8 = vadd.f32 %v940_v3, %v868_v24 }
 0x1b3   : > { %v1519_v10 = vpop.eup %1518  ;;  %1400 = vmatprep.mubr.f32.mxu1 %v1249_v2  ;;  %v979_v11 = vadd.f32 %v931_v7, %v867_v25  ;;  %v952_v13 = vmul.f32 0.6931472, %v1517_v5 }
 0x1b4   : > { %1401 = vmatmul.mubr.f32.vlgmr.msra.gmra.mrb[0].mxu1 %v1250_v6  ;;  %v943_v16 = vmul.f32 0.6931472, %v1519_v10  ;;  %v1252_v12 = vadd.f32 -0.6931472, %v980_v8 }
 0x1b5   : > { %v1251_v20 = vadd.f32 -0.6931472, %v979_v11  ;;  %v958_v21 = vsel %vm957_vm6, %v955_v9, %v952_v13 }
 0x1b6   : > { %v1521_v23 = vpop.eup %1520  ;;  %v949_v24 = vsel %vm948_vm7, %v946_v17, %v943_v16  ;;  %v982_v25 = vadd.f32 %v958_v21, %v870_v26 }
 0x1b7   : > { %v1523_v29 = vpop.eup %1522  ;;  %1403 = vmatprep.mubr.f32.mxu1 %v1251_v20  ;;  %v981_v30 = vadd.f32 %v949_v24, %v869_v28  ;;  %v970_v15 = vmul.f32 0.6931472, %v1521_v23 }
 0x1b8   : > { %1404 = vmatmul.mubr.f32.gmra.mrb[2].mxu1 %v1252_v12  ;;  %v961_v34 = vmul.f32 0.6931472, %v1523_v29  ;;  %v1254_v37 = vadd.f32 -0.6931472, %v982_v25 }
 0x1b9   : > { %v1253_v44 = vadd.f32 -0.6931472, %v981_v30  ;;  %v976_v26 = vsel %vm975_vm8, %v973_v32, %v970_v15 }
 0x1ba   : > { %v967_v38 = vsel %vm966_vm9, %v964_v35, %v961_v34  ;;  %v984_v47 = vadd.f32 %v976_v26, %v872_v33 }
 0x1bb   : > { %1406 = vmatprep.mubr.f32.mxu1 %v1253_v44  ;;  %v983_v28 = vadd.f32 %v967_v38, %v871_v36 }
 0x1bc   : > { %1407 = vmatmul.mubr.f32.gmra.mrb[4].mxu1 %v1254_v37  ;;  %v1256_v39 = vadd.f32 -0.6931472, %v984_v47 }
 0x1bd   : > { %v1255_v27 = vadd.f32 -0.6931472, %v983_v28 }
 0x1bf   : > { %1409 = vmatprep.mubr.f32.mxu1 %v1255_v27 }
 0x1c0   : > { %1410 = vmatmul.mubr.f32.gmra.mrb[6].mxu1 %v1256_v39 }
 0x287   : > { %v1402_v57 = vpop.f32.mrb[0].mxu1 }
 0x288   : > { %v1088_v31 = vadd.f32 %v1402_v57, %v1257_v54  ;;  %v1082_v40 = vpop.f32.mrb[1].mxu1 }
 0x289   : > { %v1083_v41 = vadd.f32 %v1257_v54, %v1082_v40 }
 0x28a   : > { %1122 = vst.msk [vmem:[%s329_s9 + $0x8] sm:$0xff] %vm712_vm2, %v1088_v31 }
 0x28b   : > { %1121 = vst.msk [vmem:[%s329_s9] sm:$0xff] %vm712_vm2, %v1083_v41  ;;  %v1405_v42 = vpop.f32.mrb[2].mxu1 }
 0x28c   : > { %v1098_v43 = vadd.f32 %v1405_v42, %v1257_v54  ;;  %v1092_v45 = vpop.f32.mrb[3].mxu1 }
 0x28d   : > { %v1093_v46 = vadd.f32 %v1257_v54, %v1092_v45 }
 0x28e   : > { %1124 = vst.msk [vmem:[%s329_s9 + $0x18] sm:$0xff] %vm712_vm2, %v1098_v43 }
 0x28f   : > { %1123 = vst.msk [vmem:[%s329_s9 + $0x10] sm:$0xff] %vm712_vm2, %v1093_v46  ;;  %v1408_v48 = vpop.f32.mrb[4].mxu1 }
 0x290   : > { %v1108_v49 = vadd.f32 %v1408_v48, %v1257_v54  ;;  %v1102_v50 = vpop.f32.mrb[5].mxu1 }
 0x291   : > { %v1103_v51 = vadd.f32 %v1257_v54, %v1102_v50 }
 0x292   : > { %1126 = vst.msk [vmem:[%s329_s9 + $0x28] sm:$0xff] %vm712_vm2, %v1108_v49 }
 0x293   : > { %1125 = vst.msk [vmem:[%s329_s9 + $0x20] sm:$0xff] %vm712_vm2, %v1103_v51  ;;  %v1411_v52 = vpop.f32.mrb[6].mxu1 }
 0x294   : > { %v1118_v53 = vadd.f32 %v1411_v52, %v1257_v54  ;;  %v1112_v55 = vpop.f32.mrb[7].mxu1 }
 0x295   : > { %v1113_v56 = vadd.f32 %v1257_v54, %v1112_v55 }
 0x296   : > { %1128 = vst.msk [vmem:[%s329_s9 + $0x38] sm:$0xff] %vm712_vm2, %v1118_v53 }
 0x297   : > { %1127 = vst.msk [vmem:[%s329_s9 + $0x30] sm:$0xff] %vm712_vm2, %v1113_v56 }
 0x298 PF: > { %s18_s27 = sadd.s32 1, %s1530_s27  }
 0x299   : > { %p15_p4 = scmp.ge.s32.totalorder %s18_s27, 4  }
 0x29b   :  { %17 = sbr.rel (!%p15_p4) target bundleno = 1 (0x1), region = 85 }

</bundles_post_ra>
